<compile_context>
chip_gen: v6e
topology: v6e:2x2x1
jax: 0.10.0
libtpu: 0.0.40
codegen_flags: <defaults>
</compile_context>

<pallas_src>
import jax
import jax.numpy as jnp
from jax import lax
from jax.experimental import pallas as pl
from jax.experimental.pallas import tpu as pltpu

EPS = 1e-5  # PyTorch InstanceNorm2d default


def _conv2d_block_kernel(x_ref, w_ref, sel_ref, gamma_ref, beta_ref, out_ref):
    # x_ref:     (Nb, Hp, Wp*Cin)      bf16  zero-padded input, lane-dense
    # w_ref:     (KH*Wp*Cin, Wo*Cout)  bf16  banded im2row conv weights
    # sel_ref:   (Wo*Cout, Cout)       f32   0/1 channel-sum selector (IN stats)
    # gamma_ref: (1, Cout)             f32   InstanceNorm affine weight
    # beta_ref:  (1, Cout)             f32   InstanceNorm affine bias
    # out_ref:   (Nb, Ho, Wo*Cout)     f32   lane-dense output slab
    nb, hp, wpc = x_ref.shape
    woc, cout = sel_ref.shape
    ho = out_ref.shape[1]
    wo = woc // cout
    kh = hp - ho + 1  # valid conv along H over the padded input

    x = x_ref[...]  # (Nb, Hp, Wp*Cin) bf16

    # --- Conv2d(3x3, stride 1, bias=False) as ONE MXU contraction -----------
    # LHS row (n, h) = padded input rows h..h+KH-1 flattened; the banded weight
    # (built in the wrapper) zeroes taps outside each output column's window.
    lhs = jnp.concatenate(
        [x[:, i:i + ho, :].reshape(nb * ho, wpc) for i in range(kh)], axis=-1)
    y = jnp.dot(lhs, w_ref[...],
                preferred_element_type=jnp.float32)        # (Nb*Ho, Wo*Cout) f32

    # --- InstanceNorm2d(Cout, affine=True), training-mode statistics --------
    # Per-(image, channel) sums over the (w, c)-interleaved lane axis via a
    # 0/1 selector matmul, then over rows; single-pass biased variance.
    sel = sel_ref[...]                                               # (Wo*Cout, Cout)
    row_sum = jnp.dot(y, sel, preferred_element_type=jnp.float32)    # (Nb*Ho, Cout)
    row_sqs = jnp.dot(y * y, sel, preferred_element_type=jnp.float32)
    inv_cnt = 1.0 / float(ho * wo)
    mean = row_sum.reshape(nb, ho, cout).sum(axis=1, keepdims=True) * inv_cnt  # (Nb,1,Cout)
    ex2 = row_sqs.reshape(nb, ho, cout).sum(axis=1, keepdims=True) * inv_cnt
    var = ex2 - mean * mean                                          # biased, single pass
    scale = gamma_ref[...] * lax.rsqrt(var + EPS)                    # (Nb,1,Cout)
    shift = beta_ref[...] - mean * scale                             # (Nb,1,Cout)
    # Tile the per-channel affine across the (w, c)-interleaved lane axis.
    scale_l = jnp.concatenate([scale] * wo, axis=-1)                 # (Nb,1,Wo*Cout)
    shift_l = jnp.concatenate([shift] * wo, axis=-1)

    # --- ReLU + lane-dense store ---------------------------------------------
    yn = y.reshape(nb, ho, woc) * scale_l + shift_l
    out_ref[...] = jnp.maximum(yn, 0.0).astype(out_ref.dtype)


def _round_up(x, m):
    return ((x + m - 1) // m) * m


def _pick_images_per_step(n, per_image_bytes, budget_bytes=8 * 1024 * 1024):
    """Largest divisor of n that fits the per-step VMEM budget while keeping
    >= 2 grid steps (so v7x's two TensorCores both get work on the parallel
    batch axis). Budget is conservative for v7x's 64 MiB VMEM."""
    best = 1
    for nb in range(1, n + 1):
        if n % nb:
            continue
        if nb * per_image_bytes > budget_bytes:
            continue
        if n >= 2 and n // nb < 2:
            continue
        best = nb
    return best


def conv2d_block(x_nchw, w_oihw, gamma, beta, *, padding=1,
                 images_per_step=None, mxu_dtype=jnp.bfloat16):
    """Fused ZeroPad2d -> Conv2d(bias=False) -> InstanceNorm2d(affine) -> ReLU.

    x_nchw: (N, Cin, H, W) f32; w_oihw: (Cout, Cin, KH, KW);
    gamma, beta: (Cout,) InstanceNorm affine params. Returns (N, Cout, Ho, Wo).
    """
    n, cin, h, w = x_nchw.shape
    cout, _, kh, kw = w_oihw.shape
    hp, wp = h + 2 * padding, w + 2 * padding
    ho, wo = hp - kh + 1, wp - kw + 1

    # ---- host-side layout plumbing (free) -----------------------------------
    # NCHW -> NHWC, ZeroPad2d, flatten (Wp, Cin) into one lane-dense axis.
    x_nhwc = jnp.transpose(x_nchw, (0, 2, 3, 1))
    xp = jnp.pad(x_nhwc, ((0, 0), (padding, padding), (padding, padding), (0, 0)))
    x2 = xp.reshape(n, hp, wp * cin).astype(mxu_dtype)

    # Banded im2row weight: B[i*Wp*Cin + wp_*Cin + ci, w_*Cout + c]
    #   = W[i, wp_-w_, ci, c] if 0 <= wp_-w_ < KW else 0
    w_hwio = jnp.transpose(w_oihw, (2, 3, 1, 0)).astype(jnp.float32)   # (KH,KW,Cin,Cout)
    wp_idx = jnp.arange(wp).reshape(1, wp, 1, 1, 1, 1)
    j_idx = jnp.arange(kw).reshape(1, 1, kw, 1, 1, 1)
    w_idx = jnp.arange(wo).reshape(1, 1, 1, 1, wo, 1)
    tap_mask = (wp_idx == w_idx + j_idx).astype(jnp.float32)           # (1,Wp,KW,1,Wo,1)
    b_mat = (tap_mask * w_hwio[:, None, :, :, None, :]).sum(axis=2)    # (KH,Wp,Cin,Wo,Cout)
    b_mat = b_mat.reshape(kh * wp * cin, wo * cout).astype(mxu_dtype)

    # 0/1 selector summing the (w, c)-interleaved lane axis per channel.
    sel = jnp.tile(jnp.eye(cout, dtype=jnp.float32), (wo, 1))          # (Wo*Cout, Cout)

    gamma2 = gamma.reshape(1, cout).astype(jnp.float32)
    beta2 = beta.reshape(1, cout).astype(jnp.float32)

    # ---- per-step batching (amortize ~0.35 us/step grid overhead) -----------
    if images_per_step is None:
        per_img = (2 * hp * _round_up(wp * cin, 128) * 2        # x block, double-buffered, bf16
                   + ho * _round_up(kh * wp * cin, 128) * 2     # im2row band, bf16
                   + 4 * ho * _round_up(wo * cout, 128) * 4)    # f32 temporaries (y, y*y, yn, out)
        images_per_step = _pick_images_per_step(n, per_img)
    nb = images_per_step
    if n % nb:
        raise ValueError(f"images_per_step={nb} must divide batch size {n}")

    out = pl.pallas_call(
        _conv2d_block_kernel,
        out_shape=jax.ShapeDtypeStruct((n, ho, wo * cout), jnp.float32),
        grid_spec=pltpu.PrefetchScalarGridSpec(
            num_scalar_prefetch=0,
            grid=(n // nb,),
            in_specs=[
                pl.BlockSpec((nb, hp, wp * cin), lambda b: (b, 0, 0)),
                pl.BlockSpec((kh * wp * cin, wo * cout), lambda b: (0, 0)),
                pl.BlockSpec((wo * cout, cout), lambda b: (0, 0)),
                pl.BlockSpec((1, cout), lambda b: (0, 0)),
                pl.BlockSpec((1, cout), lambda b: (0, 0)),
            ],
            out_specs=pl.BlockSpec((nb, ho, wo * cout), lambda b: (b, 0, 0)),
        ),
        compiler_params=pltpu.CompilerParams(
            dimension_semantics=("parallel",),
            vmem_limit_bytes=32 * 1024 * 1024,
        ),
    )(x2, b_mat, sel, gamma2, beta2)

    # lane-dense slab -> NCHW (free layout plumbing on the wrapper side)
    out = out.reshape(n, ho, wo, cout)
    return jnp.transpose(out, (0, 3, 1, 2)).astype(x_nchw.dtype)


def _reference(x_nchw, w_oihw, gamma, beta, *, padding=1, conv_dtype=jnp.bfloat16):
    """Pure-JAX mirror of the PyTorch Sequential: pad -> conv -> IN -> ReLU.
    Conv inputs are rounded to the same MXU dtype the kernel uses so both
    paths see identical input rounding (accumulation is f32 in both)."""
    xp = jnp.pad(x_nchw, ((0, 0), (0, 0), (padding, padding), (padding, padding)))
    y = lax.conv_general_dilated(
        xp.astype(conv_dtype), w_oihw.astype(conv_dtype),
        window_strides=(1, 1), padding="VALID",
        dimension_numbers=("NCHW", "OIHW", "NCHW"),
        preferred_element_type=jnp.float32)
    mean = jnp.mean(y, axis=(2, 3), keepdims=True)
    var = jnp.mean((y - mean) ** 2, axis=(2, 3), keepdims=True)   # biased
    yn = (y - mean) * lax.rsqrt(var + EPS)
    yn = yn * gamma[None, :, None, None] + beta[None, :, None, None]
    return jnp.maximum(yn, 0.0)


if __name__ == "__main__":
    # Conv2dBlock(input_dim=4, output_dim=8, kernel_size=3, stride=1, padding=1,
    #             norm='in', activation='relu', pad_type='zero', bias=False)
    N, CIN, H, W = 2, 4, 16, 16
    COUT, KH, KW = 8, 3, 3

    key = jax.random.PRNGKey(0)
    kx, kw_, kg, kb = jax.random.split(key, 4)
    x = jax.random.normal(kx, (N, CIN, H, W), dtype=jnp.float32)
    w_oihw = jax.random.normal(kw_, (COUT, CIN, KH, KW), dtype=jnp.float32) * 0.1
    gamma = jax.random.uniform(kg, (COUT,), dtype=jnp.float32) + 0.5   # IN affine weight
    beta = jax.random.normal(kb, (COUT,), dtype=jnp.float32) * 0.1     # IN affine bias

    out = conv2d_block(x, w_oihw, gamma, beta, padding=1)
    out = jax.block_until_ready(out)

    ref = _reference(x, w_oihw, gamma, beta, padding=1)
    assert out.shape == (N, COUT, H, W), out.shape
    err = float(jnp.max(jnp.abs(out - ref)))
    assert err < 1e-3, err

    print("KERNEL_OK")
</pallas_src>

<mosaic_0001>
module attributes {stable_mosaic.version = 11 : i64} {
  func.func @_conv2d_block_kernel(%arg0: i32, %arg1: memref<1x18x72xbf16, #tpu.memory_space<vmem>>, %arg2: memref<216x128xbf16, #tpu.memory_space<vmem>>, %arg3: memref<128x8xf32, #tpu.memory_space<vmem>>, %arg4: memref<1x8xf32, #tpu.memory_space<vmem>>, %arg5: memref<1x8xf32, #tpu.memory_space<vmem>>, %arg6: memref<1x16x128xf32, #tpu.memory_space<vmem>>) attributes {dimension_semantics = [#tpu.dimension_semantics<parallel>], iteration_bounds = array<i64: 2>, scalar_prefetch = 0 : i64, scratch_operands = 0 : i64, tpu.core_type = #tpu.core_type<tc>, window_params = [{transform_indices = @transform_0, window_bounds = array<i64: 1, 18, 72>}, {pipeline_mode = #tpu.pipeline_mode<synchronous>, transform_indices = @transform_1, window_bounds = array<i64: 216, 128>}, {pipeline_mode = #tpu.pipeline_mode<synchronous>, transform_indices = @transform_2, window_bounds = array<i64: 128, 8>}, {pipeline_mode = #tpu.pipeline_mode<synchronous>, transform_indices = @transform_3, window_bounds = array<i64: 1, 8>}, {pipeline_mode = #tpu.pipeline_mode<synchronous>, transform_indices = @transform_4, window_bounds = array<i64: 1, 8>}, {transform_indices = @transform_5, window_bounds = array<i64: 1, 16, 128>}]} {
    %c0 = arith.constant 0 : index
    %c0_0 = arith.constant 0 : index
    %c0_1 = arith.constant 0 : index
    %0 = vector.load %arg1[%c0, %c0_0, %c0_1] : memref<1x18x72xbf16, #tpu.memory_space<vmem>>, vector<1x18x72xbf16>
    %1 = vector.extract_strided_slice %0 {offsets = [0, 0, 0], sizes = [1, 16, 72], strides = [1, 1, 1]} : vector<1x18x72xbf16> to vector<1x16x72xbf16>
    %2 = vector.shape_cast %1 : vector<1x16x72xbf16> to vector<16x72xbf16>
    %3 = vector.extract_strided_slice %0 {offsets = [0, 1, 0], sizes = [1, 16, 72], strides = [1, 1, 1]} : vector<1x18x72xbf16> to vector<1x16x72xbf16>
    %4 = vector.shape_cast %3 : vector<1x16x72xbf16> to vector<16x72xbf16>
    %5 = vector.extract_strided_slice %0 {offsets = [0, 2, 0], sizes = [1, 16, 72], strides = [1, 1, 1]} : vector<1x18x72xbf16> to vector<1x16x72xbf16>
    %6 = vector.shape_cast %5 : vector<1x16x72xbf16> to vector<16x72xbf16>
    %7 = tpu.concatenate %2, %4, %6 in 1 : vector<16x72xbf16>, vector<16x72xbf16>, vector<16x72xbf16> -> vector<16x216xbf16>
    %c0_2 = arith.constant 0 : index
    %c0_3 = arith.constant 0 : index
    %8 = vector.load %arg2[%c0_2, %c0_3] : memref<216x128xbf16, #tpu.memory_space<vmem>>, vector<216x128xbf16>
    %cst = arith.constant dense<0.000000e+00> : vector<16x128xf32>
    %9 = tpu.matmul %7, %8, %cst {dimension_numbers = #tpu.dot_dimension_numbers<[1], [0], [0], [1], [0, 0, 1, 1], [], []>} : vector<16x216xbf16>, vector<216x128xbf16>, vector<16x128xf32> -> vector<16x128xf32>
    %c0_4 = arith.constant 0 : index
    %c0_5 = arith.constant 0 : index
    %10 = vector.load %arg3[%c0_4, %c0_5] : memref<128x8xf32, #tpu.memory_space<vmem>>, vector<128x8xf32>
    %cst_6 = arith.constant dense<0.000000e+00> : vector<16x8xf32>
    %11 = tpu.matmul %9, %10, %cst_6 {dimension_numbers = #tpu.dot_dimension_numbers<[1], [0], [0], [1], [0, 0, 1, 1], [], []>} : vector<16x128xf32>, vector<128x8xf32>, vector<16x8xf32> -> vector<16x8xf32>
    %12 = arith.mulf %9, %9 : vector<16x128xf32>
    %cst_7 = arith.constant dense<0.000000e+00> : vector<16x8xf32>
    %13 = tpu.matmul %12, %10, %cst_7 {dimension_numbers = #tpu.dot_dimension_numbers<[1], [0], [0], [1], [0, 0, 1, 1], [], []>} : vector<16x128xf32>, vector<128x8xf32>, vector<16x8xf32> -> vector<16x8xf32>
    %14 = vector.shape_cast %11 : vector<16x8xf32> to vector<1x16x8xf32>
    %cst_8 = arith.constant dense<0.000000e+00> : vector<1x8xf32>
    %15 = vector.multi_reduction <add>, %14, %cst_8 [1] : vector<1x16x8xf32> to vector<1x8xf32>
    %16 = vector.shape_cast %15 : vector<1x8xf32> to vector<1x1x8xf32>
    %cst_9 = arith.constant 3.906250e-03 : f32
    %17 = vector.broadcast %cst_9 : f32 to vector<1x1x8xf32>
    %18 = arith.mulf %16, %17 : vector<1x1x8xf32>
    %19 = vector.shape_cast %13 : vector<16x8xf32> to vector<1x16x8xf32>
    %cst_10 = arith.constant dense<0.000000e+00> : vector<1x8xf32>
    %20 = vector.multi_reduction <add>, %19, %cst_10 [1] : vector<1x16x8xf32> to vector<1x8xf32>
    %21 = vector.shape_cast %20 : vector<1x8xf32> to vector<1x1x8xf32>
    %cst_11 = arith.constant 3.906250e-03 : f32
    %22 = vector.broadcast %cst_11 : f32 to vector<1x1x8xf32>
    %23 = arith.mulf %21, %22 : vector<1x1x8xf32>
    %24 = arith.mulf %18, %18 : vector<1x1x8xf32>
    %25 = arith.subf %23, %24 : vector<1x1x8xf32>
    %c0_12 = arith.constant 0 : index
    %c0_13 = arith.constant 0 : index
    %26 = vector.load %arg4[%c0_12, %c0_13] : memref<1x8xf32, #tpu.memory_space<vmem>>, vector<1x8xf32>
    %cst_14 = arith.constant 9.99999974E-6 : f32
    %27 = vector.broadcast %cst_14 : f32 to vector<1x1x8xf32>
    %28 = arith.addf %25, %27 : vector<1x1x8xf32>
    %29 = math.rsqrt %28 : vector<1x1x8xf32>
    %30 = vector.shape_cast %26 : vector<1x8xf32> to vector<1x1x8xf32>
    %31 = arith.mulf %30, %29 : vector<1x1x8xf32>
    %c0_15 = arith.constant 0 : index
    %c0_16 = arith.constant 0 : index
    %32 = vector.load %arg5[%c0_15, %c0_16] : memref<1x8xf32, #tpu.memory_space<vmem>>, vector<1x8xf32>
    %33 = arith.mulf %18, %31 : vector<1x1x8xf32>
    %34 = vector.shape_cast %32 : vector<1x8xf32> to vector<1x1x8xf32>
    %35 = arith.subf %34, %33 : vector<1x1x8xf32>
    %36 = tpu.concatenate %31, %31, %31, %31, %31, %31, %31, %31, %31, %31, %31, %31, %31, %31, %31, %31 in 2 : vector<1x1x8xf32>, vector<1x1x8xf32>, vector<1x1x8xf32>, vector<1x1x8xf32>, vector<1x1x8xf32>, vector<1x1x8xf32>, vector<1x1x8xf32>, vector<1x1x8xf32>, vector<1x1x8xf32>, vector<1x1x8xf32>, vector<1x1x8xf32>, vector<1x1x8xf32>, vector<1x1x8xf32>, vector<1x1x8xf32>, vector<1x1x8xf32>, vector<1x1x8xf32> -> vector<1x1x128xf32>
    %37 = tpu.concatenate %35, %35, %35, %35, %35, %35, %35, %35, %35, %35, %35, %35, %35, %35, %35, %35 in 2 : vector<1x1x8xf32>, vector<1x1x8xf32>, vector<1x1x8xf32>, vector<1x1x8xf32>, vector<1x1x8xf32>, vector<1x1x8xf32>, vector<1x1x8xf32>, vector<1x1x8xf32>, vector<1x1x8xf32>, vector<1x1x8xf32>, vector<1x1x8xf32>, vector<1x1x8xf32>, vector<1x1x8xf32>, vector<1x1x8xf32>, vector<1x1x8xf32>, vector<1x1x8xf32> -> vector<1x1x128xf32>
    %38 = vector.shape_cast %9 : vector<16x128xf32> to vector<1x16x128xf32>
    %39 = vector.broadcast %36 : vector<1x1x128xf32> to vector<1x16x128xf32>
    %40 = arith.mulf %38, %39 : vector<1x16x128xf32>
    %41 = vector.broadcast %37 : vector<1x1x128xf32> to vector<1x16x128xf32>
    %42 = arith.addf %40, %41 : vector<1x16x128xf32>
    %cst_17 = arith.constant 0.000000e+00 : f32
    %43 = vector.broadcast %cst_17 : f32 to vector<1x16x128xf32>
    %44 = arith.maximumf %42, %43 : vector<1x16x128xf32>
    %c0_18 = arith.constant 0 : index
    %c0_19 = arith.constant 0 : index
    %c0_20 = arith.constant 0 : index
    %45 = vector.load %arg6[%c0_18, %c0_19, %c0_20] : memref<1x16x128xf32, #tpu.memory_space<vmem>>, vector<1x16x128xf32>
    tpu.vector_store %arg6[%c0_18, %c0_19, %c0_20], %44 {strides = array<i32>} : memref<1x16x128xf32, #tpu.memory_space<vmem>>, vector<1x16x128xf32>,
    return
  }
  func.func @transform_0(%arg0: i32) -> (i32, i32, i32) {
    %c0_i32 = arith.constant 0 : i32
    %c0_i32_0 = arith.constant 0 : i32
    %c0_i32_1 = arith.constant 0 : i32
    return %arg0, %c0_i32, %c0_i32_0 : i32, i32, i32
  }
  func.func @transform_1(%arg0: i32) -> (i32, i32) {
    %c0_i32 = arith.constant 0 : i32
    %c0_i32_0 = arith.constant 0 : i32
    %c0_i32_1 = arith.constant 0 : i32
    return %c0_i32, %c0_i32_0 : i32, i32
  }
  func.func @transform_2(%arg0: i32) -> (i32, i32) {
    %c0_i32 = arith.constant 0 : i32
    %c0_i32_0 = arith.constant 0 : i32
    %c0_i32_1 = arith.constant 0 : i32
    return %c0_i32, %c0_i32_0 : i32, i32
  }
  func.func @transform_3(%arg0: i32) -> (i32, i32) {
    %c0_i32 = arith.constant 0 : i32
    %c0_i32_0 = arith.constant 0 : i32
    %c0_i32_1 = arith.constant 0 : i32
    return %c0_i32, %c0_i32_0 : i32, i32
  }
  func.func @transform_4(%arg0: i32) -> (i32, i32) {
    %c0_i32 = arith.constant 0 : i32
    %c0_i32_0 = arith.constant 0 : i32
    %c0_i32_1 = arith.constant 0 : i32
    return %c0_i32, %c0_i32_0 : i32, i32
  }
  func.func @transform_5(%arg0: i32) -> (i32, i32, i32) {
    %c0_i32 = arith.constant 0 : i32
    %c0_i32_0 = arith.constant 0 : i32
    %c0_i32_1 = arith.constant 0 : i32
    return %arg0, %c0_i32, %c0_i32_0 : i32, i32, i32
  }
}

</mosaic_0001>

<bundles_post_ra>
// kernel: tpu_custom_call.1
= control target key start
LH: loop header
LB: loop body
LE: loop exit
PB: predicated region body
PF: predicated region fallthrough
CT: control target
= control target key end

     0   :  { %10 = vsyncpa [#allocation3], 0  ;;  %s1545_s0 = inlined_call_operand.vmem [shape: bf16[2,18,72], index: 0, kind: input, shape index: {}]   ;;  %s1546_s1 = inlined_call_operand.vmem [shape: bf16[216,128], index: 1, kind: input, shape index: {}]   ;;  %s1547_s2 = inlined_call_operand.vmem [shape: f32[128,8], index: 2, kind: input, shape index: {}]   ;;  %s1548_s3 = inlined_call_operand.vmem [shape: f32[1,8], index: 3, kind: input, shape index: {}]   ;;  %s1549_s4 = inlined_call_operand.vmem [shape: f32[1,8], index: 4, kind: input, shape index: {}]   ;;  %s1550_s5 = inlined_call_operand.hbm [shape: f32[2,16,128], index: 5, kind: output, shape index: {}]  }
   0x1   :  { %12 = vsyncpa [#allocation3 + $0x1], 0  ;;  %s1170_s18 = smov 0   ;;  %s1172_s19 = smov 0  }
   0x2   :  { %s1174_s20 = smov 0   ;;  %s1176_s21 = smov 0  }
   0x3 LB: > { %s1191_s22 = sadd.s32 4294967295, %s1120_s21   ;;  %s850_s23 = sadd.s32 4294967294, %s1120_s21   ;;  %s1120_s21 = sphi %s1176_s21, %s1556_s21   ;;  %s1116_s20 = sphi %s1174_s20, %s1555_s20   ;;  %s1112_s19 = sphi %s1172_s19, %s1554_s19   ;;  %s1108_s18 = sphi %s1170_s18, %s1553_s18  }
   0x4   : > { %s1195_s24 = sadd.s32 1, %s1120_s21   ;;  %s135_s25 = sadd.s32 1, %s1116_s20 }
   0x5   : > { %s132_s26 = ssub.s32 %s1120_s21, %s1195_s24  ;;  %p145_p0 = scmp.ne.s32.totalorder %s1116_s20, %s1112_s19 }
   0x6   : > { %p133_p1 = scmp.eq.s32.totalorder %s132_s26, 0  ;;  %p146_p2 = scmp.eq.s32.totalorder %s1191_s22, 1 }
   0x7   : > { %p151_p3 = scmp.ne.s32.totalorder %s1112_s19, %s1108_s18  ;;  %p152_p4 = scmp.eq.s32.totalorder %s850_s23, 1 }
   0x8   : > { %s1206_s27 = scalar_select %p133_p1, %s1116_s20, %s135_s25  }
   0x9   : > { %p1208_p5 = por %p146_p2, %p145_p0  ;;  %p1212_p6 = por %p152_p4, %p151_p3 }
   0xa   : > { %p853_p7 = scmp.ge.s32.totalorder %s1120_s21, 1  ;;  %p190_p8 = scmp.lt.s32.totalorder %s1120_s21, 3 }
   0xc   : > { %p191_p9 = pnand %p853_p7, %p190_p8 }
   0xd   : > { %p218_p10 = scmp.lt.s32.totalorder (!%p191_p9), %s1191_s22, 1  ;;  %s1123_s26 = smov (!%p191_p9), 72  }
   0xe   : > { %194 = sbr.rel (%p191_p9) target bundleno = 812 (0x32c), region = 40  ;;  %s1125_s23 = smov (!%p191_p9), 24  }
   0xf   : > { %s1126_s25 = smov (!%p191_p9), 8   ;;  %s1127_s30 = smov (!%p191_p9), 32  }
  0x10   : > { %s1128_s6 = smov (!%p191_p9), 40   ;;  %s1130_s8 = smov (!%p191_p9), 56  }
  0x11   : > { %s1131_s9 = smov (!%p191_p9), 64   ;;  %s1133_s11 = smov (!%p191_p9), 88  }
  0x12   : > { %s1134_s12 = smov (!%p191_p9), 96   ;;  %s1135_s14 = smov (!%p191_p9), 104  }
  0x13   : > { %v1122_v0 = vmov 0   ;;  %v1044_v1 = vld [vmem:[%s1546_s1 + $0x38] sm:$0xff]   ;;  %s219_s7 = scalar_select %p218_p10, %s1191_s22, 1  ;;  %v1045_v2 = vld [vmem:[%s1546_s1 + $0x30] sm:$0xff]   ;;  %v1046_v3 = vld [vmem:[%s1546_s1 + $0x28] sm:$0xff]   ;;  %vm250_vm1 = vcmask 1046528  }
  0x14   : > { %378 = vmatprep.subr.bf16.mxu0 %v1122_v0  ;;  %vm235_vm0 = vsmask.f32 7424  ;;  %v1047_v9 = vld [vmem:[%s1546_s1 + $0x20] sm:$0xff]   ;;  %v1048_v15 = vld [vmem:[%s1546_s1 + $0x18] sm:$0xff]   ;;  %v1257_v18 = vld [vmem:[%s1547_s2 + $0x70] sm:$0xff]  ;;  %vm374_vm2 = vcmask 1043456  }
  0x15   : > { %379 = vmatpush1.bf16.msra.mxu0 %v1044_v1  ;;  %s985_s10 = smul.u32 12, %s219_s7  ;;  %v1252_v17 = vld [vmem:[%s1547_s2 + $0x78] sm:$0xff]  ;;  %v1049_v20 = vld [vmem:[%s1546_s1 + $0x10] sm:$0xff]   ;;  %v1267_v21 = vld [vmem:[%s1547_s2 + $0x68] sm:$0xff]  ;;  %vm260_vm3 = vcmask 130048   ;;  %vm371_vm4 = vcmask 719872  }
  0x16   : > { %380 = vmatprep.subr.bf16.mxu0 %v1122_v0  ;;  %915 = vmatprep.subr.mxu1 %v1252_v17  ;;  %v1276_v22 = vld [vmem:[%s1547_s2 + $0x60] sm:$0xff]  ;;  %v1050_v23 = vld [vmem:[%s1546_s1 + $0x8] sm:$0xff]   ;;  %v1286_v24 = vld [vmem:[%s1547_s2 + $0x58] sm:$0xff]  ;;  %vm256_vm5 = vcmask 588800   ;;  %vm587_vm6 = vcmask 64512   ;;  %s1129_s7 = smov 48  }
  0x17   : > { %s222_s13 = scalar_lea.vmem %s1545_s0, %s985_s10  ;;  %916 = vmatpush3.msra.mxu1 %v1252_v17  ;;  %v1294_v25 = vld [vmem:[%s1547_s2 + $0x50] sm:$0xff]  ;;  %v1051_v26 = vld [vmem:[%s1546_s1] sm:$0xff]   ;;  %v1304_v27 = vld [vmem:[%s1547_s2 + $0x48] sm:$0xff]  ;;  %s1132_s10 = smov 80   ;;  %vm669_vm7 = vcmask 195584   ;;  %vm671_vm8 = vcmask 261120  }
  0x18   : > { %v1234_v4 = vld [vmem:[%s222_s13] sm:$0xff]   ;;  %v1043_v5 = vld [vmem:[%s222_s13 + $0x8] ss:$0 sps:$4 sm:$0x11]   ;;  %917 = vmatprep.subr.mxu1 %v1257_v18  ;;  %s1124_s13 = smov 16   ;;  %v1322_v30 = vld [vmem:[%s1547_s2 + $0x38] sm:$0xff] }
  0x19   : > { %381 = vmatpush1.bf16.msra.mxu0 %v1045_v2  ;;  %v237_v6 = vshrl.u32 %v1234_v4, 16  ;;  %v239_v7 = vshll.u32 %v1234_v4, 16  ;;  %v244_v8 = vshll.u32 %v1043_v5, 16  ;;  %v251_v13 = vrot.slane %v1234_v4, 1  ;;  %918 = vmatpush3.msra.mxu1 %v1257_v18  ;;  %v1052_v28 = vld [vmem:[%s1546_s1 + $0x68] ss:$0 sps:$4 sm:$0xff]  }
  0x1a   : > { %382 = vmatprep.subr.bf16.mxu0 %v1122_v0  ;;  %v252_v14 = vrot.slane %v1043_v5, 1  ;;  %919 = vmatprep.subr.mxu1 %v1267_v21  ;;  %v1315_v29 = vld [vmem:[%s1547_s2 + $0x40] sm:$0xff]  ;;  %v376_v31 = vsel %vm374_vm2, %v1052_v28, 0  ;;  %v1330_v32 = vld [vmem:[%s1547_s2 + $0x30] sm:$0xff]  ;;  %v1340_v34 = vld [vmem:[%s1547_s2 + $0x28] sm:$0xff]  ;;  %s1137_s15 = smov 120  }
  0x1b   : > { %v241_v10 = vrot.slane %v239_v7, 1  ;;  %v246_v11 = vrot.slane %v244_v8, 1  ;;  %920 = vmatpush3.msra.mxu1 %v1267_v21  ;;  %v1053_v33 = vld [vmem:[%s1546_s1 + $0x60] sm:$0xff]   ;;  %v1054_v36 = vld [vmem:[%s1546_s1 + $0x58] sm:$0xff]   ;;  %v1366_v38 = vld [vmem:[%s1547_s2 + $0x10] sm:$0xff]  ;;  %vm673_vm9 = vcmask 326656  }
  0x1c   : > { %v253_v19 = vsel %vm250_vm1, %v251_v13, %v252_v14  ;;  %921 = vmatprep.subr.mxu1 %v1276_v22  ;;  %v1348_v35 = vld [vmem:[%s1547_s2 + $0x20] sm:$0xff]  ;;  %v1358_v37 = vld [vmem:[%s1547_s2 + $0x18] sm:$0xff]  ;;  %v1055_v39 = vld [vmem:[%s1546_s1 + $0x50] sm:$0xff]   ;;  %vm675_vm10 = vcmask 392192   ;;  %vm677_vm11 = vcmask 457728   ;;  %vm679_vm12 = vcmask 523264  }
  0x1d   : > { %383 = vmatpush1.bf16.msra.mxu0 %v1046_v3  ;;  %v242_v12 = vor.u32 %v241_v10, %v237_v6  ;;  %922 = vmatpush3.msra.mxu1 %v1276_v22  ;;  %v1056_v40 = vld [vmem:[%s1546_s1 + $0x48] sm:$0xff]   ;;  %v1057_v41 = vld [vmem:[%s1546_s1 + $0x40] sm:$0xff]   ;;  %vm682_vm13 = vcmask 654336   ;;  %vm685_vm14 = vcmask 785408   ;;  %vm687_vm15 = vcmask 850944   ;;  %s878_s17 = sshll.u32 %s1191_s22, 8 }
  0x1e   : > { %384 = vmatprep.subr.bf16.mxu0 %v1122_v0  ;;  %923 = vmatprep.subr.mxu1 %v1286_v24  ;;  %v420_v46 = vld [vmem:[%s1547_s2 + $0x8] sm:$0xff]  ;;  %v419_v47 = vld [vmem:[%s1547_s2] sm:$0xff]  ;;  %vm691_vm1 = vcmask 982016  }
  0x1f   : > { %v247_v16 = vsel %vm235_vm0, %v242_v12, %v246_v11  ;;  %924 = vmatpush3.msra.mxu1 %v1286_v24  ;;  %vm689_vm0 = vcmask 916480  }
  0x20   : > { %248 = vrot.lane.b32.xlu0 %v247_v16, %s1123_s26  ;;  %925 = vmatprep.subr.mxu1 %v1294_v25 }
  0x21   : > { %385 = vmatpush1.bf16.msra.mxu0 %v1047_v9  ;;  %926 = vmatpush3.msra.mxu1 %v1294_v25 }
  0x22   : > { %386 = vmatprep.subr.bf16.mxu0 %v1122_v0  ;;  %927 = vmatprep.subr.mxu1 %v1304_v27 }
  0x23   : > { %928 = vmatpush3.msra.mxu1 %v1304_v27 }
  0x24   : > { %254 = vrot.lane.b32.xlu0 %v253_v19, %s1124_s13  ;;  %929 = vmatprep.subr.mxu1 %v1315_v29  ;;  %v610_v19 = vld [vmem:[%s1548_s3] sm:$0x1] }
  0x25   : > { %387 = vmatpush1.bf16.msra.mxu0 %v1048_v15  ;;  %930 = vmatpush3.msra.mxu1 %v1315_v29 }
  0x26   : > { %388 = vmatprep.subr.bf16.mxu0 %v1122_v0  ;;  %931 = vmatprep.subr.mxu1 %v1322_v30 }
  0x27   : > { %932 = vmatpush3.msra.mxu1 %v1322_v30 }
  0x28   : > { %933 = vmatprep.subr.mxu1 %v1330_v32 }
  0x29   : > { %389 = vmatpush1.bf16.msra.mxu0 %v1049_v20  ;;  %934 = vmatpush3.msra.mxu1 %v1330_v32 }
  0x2a   : > { %390 = vmatprep.subr.bf16.mxu0 %v1122_v0  ;;  %935 = vmatprep.subr.mxu1 %v1340_v34 }
  0x2b   : > { %936 = vmatpush3.msra.mxu1 %v1340_v34 }
  0x2c   : > { %937 = vmatprep.subr.mxu1 %v1348_v35 }
  0x2d   : > { %391 = vmatpush1.bf16.msra.mxu0 %v1050_v23  ;;  %938 = vmatpush3.msra.mxu1 %v1348_v35 }
  0x2e   : > { %392 = vmatprep.subr.bf16.mxu0 %v1122_v0  ;;  %939 = vmatprep.subr.mxu1 %v1358_v37 }
  0x2f   : > { %940 = vmatpush3.msra.mxu1 %v1358_v37 }
  0x30   : > { %941 = vmatprep.subr.mxu1 %v1366_v38 }
  0x31   : > { %393 = vmatpush1.bf16.msra.mxu0 %v1051_v26  ;;  %942 = vmatpush3.msra.mxu1 %v1366_v38 }
  0x32   : > { %398 = vmatprep.subr.bf16.mxu0 %v1122_v0  ;;  %943 = vmatprep.subr.mxu1 %v420_v46 }
  0x33   : > { %944 = vmatpush3.msra.mxu1 %v420_v46 }
  0x34   : > { %945 = vmatprep.subr.mxu1 %v419_v47 }
  0x35   : > { %399 = vmatpush2.bf16.msra.mxu0 %v376_v31  ;;  %946 = vmatpush3.msra.mxu1 %v419_v47 }
  0x36   : > { %400 = vmatprep.subr.bf16.mxu0 %v1122_v0  ;;  %950 = vmatprep.subr.mxu1 %v1252_v17 }
  0x39   : > { %401 = vmatpush2.bf16.msra.mxu0 %v1053_v33 }
  0x3a   : > { %402 = vmatprep.subr.bf16.mxu0 %v1122_v0 }
  0x3d   : > { %403 = vmatpush2.bf16.msra.mxu0 %v1054_v36 }
  0x3e   : > { %404 = vmatprep.subr.bf16.mxu0 %v1122_v0 }
  0x41   : > { %405 = vmatpush2.bf16.msra.mxu0 %v1055_v39 }
  0x42   : > { %406 = vmatprep.subr.bf16.mxu0 %v1122_v0 }
  0x45   : > { %407 = vmatpush2.bf16.msra.mxu0 %v1056_v40 }
  0x46   : > { %408 = vmatprep.subr.bf16.mxu0 %v1122_v0 }
  0x49   : > { %409 = vmatpush2.bf16.msra.mxu0 %v1057_v41 }
  0x92   : > { %v249_v42 = vpop.permute.xlu0 %248 }
  0x93   : > { %v258_v45 = vsel %vm256_vm5, %v1234_v4, %v249_v42 }
  0x96   : > { %v255_v43 = vpop.permute.xlu0 %254 }
  0x97   : > { %v262_v44 = vsel %vm260_vm3, %v249_v42, %v255_v43 }
  0x98   : > { %872 = vmatprep.mubr.msk.bf16.mxu0 %vm371_vm4, %v262_v44 }
  0x99   : > { %411 = vmatmul.mubr.bf16.vlgmr.msra.gmra.mxu0 %v258_v45 }
 0x159   : > { %v1395_v48 = vpop.f32.mrf.mxu0 }
 0x15a   : > { %947 = vmatprep.mubr.f32.mxu1 %v1395_v48  ;;  %v510_v50 = vmul.f32 %v1395_v48, %v1395_v48 }
 0x15b   : > { %v414_v49 = vpop.f32.mrf.mxu0 }
 0x15d   : > { %v1400_v51 = vpop.f32.mrf.mxu0 }
 0x15e   : > { %948 = vmatmul.mubr.f32.vlgmr.msra.gmra.mxu1 %v1400_v51  ;;  %v511_v53 = vmul.f32 %v1400_v51, %v1400_v51 }
 0x15f   : > { %951 = vmatpush3.msra.mxu1 %v1252_v17  ;;  %v417_v52 = vpop.f32.mrf.mxu0  ;;  %982 = vmatprep.mubr.f32.mxu1 %v510_v50  ;;  %v618_v17 = vlaneseq }
 0x160   : > { %952 = vmatprep.subr.mxu1 %v1257_v18 }
 0x161   : > { %953 = vmatpush3.msra.mxu1 %v1257_v18  ;;  %v619_v18 = vshrl.u32 %v618_v17, 7 }
 0x162   : > { %954 = vmatprep.subr.mxu1 %v1267_v21 }
 0x163   : > { %955 = vmatpush3.msra.mxu1 %v1267_v21  ;;  %v1439_v20 = vsub.s32 0, %v619_v18 }
 0x164   : > { %956 = vmatprep.subr.mxu1 %v1276_v22 }
 0x165   : > { %957 = vmatpush3.msra.mxu1 %v1276_v22 }
 0x166   : > { %958 = vmatprep.subr.mxu1 %v1286_v24 }
 0x167   : > { %959 = vmatpush3.msra.mxu1 %v1286_v24 }
 0x168   : > { %960 = vmatprep.subr.mxu1 %v1294_v25 }
 0x169   : > { %961 = vmatpush3.msra.mxu1 %v1294_v25  ;;  %v614_v25 = vld [vmem:[%s1549_s4] sm:$0x1] }
 0x16a   : > { %962 = vmatprep.subr.mxu1 %v1304_v27 }
 0x16b   : > { %963 = vmatpush3.msra.mxu1 %v1304_v27 }
 0x16c   : > { %964 = vmatprep.subr.mxu1 %v1315_v29 }
 0x16d   : > { %965 = vmatpush3.msra.mxu1 %v1315_v29 }
 0x16e   : > { %966 = vmatprep.subr.mxu1 %v1322_v30 }
 0x16f   : > { %967 = vmatpush3.msra.mxu1 %v1322_v30 }
 0x170   : > { %968 = vmatprep.subr.mxu1 %v1330_v32 }
 0x171   : > { %969 = vmatpush3.msra.mxu1 %v1330_v32 }
 0x172   : > { %970 = vmatprep.subr.mxu1 %v1340_v34 }
 0x173   : > { %971 = vmatpush3.msra.mxu1 %v1340_v34 }
 0x174   : > { %972 = vmatprep.subr.mxu1 %v1348_v35 }
 0x175   : > { %973 = vmatpush3.msra.mxu1 %v1348_v35 }
 0x176   : > { %974 = vmatprep.subr.mxu1 %v1358_v37 }
 0x177   : > { %975 = vmatpush3.msra.mxu1 %v1358_v37 }
 0x178   : > { %976 = vmatprep.subr.mxu1 %v1366_v38 }
 0x179   : > { %977 = vmatpush3.msra.mxu1 %v1366_v38 }
 0x17a   : > { %978 = vmatprep.subr.mxu1 %v420_v46 }
 0x17b   : > { %979 = vmatpush3.msra.mxu1 %v420_v46 }
 0x17c   : > { %980 = vmatprep.subr.mxu1 %v419_v47 }
 0x17d   : > { %981 = vmatpush3.msra.mxu1 %v419_v47 }
 0x17e   : > { %983 = vmatmul.mubr.f32.vlgmr.msra.gmra.mxu1 %v511_v53 }
 0x21e   : > { %v949_v54 = vpop.f32.mrf.mxu1 }
 0x21f   : > { %v589_v57 = vsel %vm587_vm6, %v949_v54, 0.0 }
 0x220   : > { %v501_v55 = vpop.f32.mrf.mxu1 }
 0x221   : > { %v588_v56 = vsel %vm587_vm6, %v501_v55, 0.0 }
 0x222   : > { %v590_v58 = vadd.f32 %v589_v57, %v588_v56 }
 0x224   : > { %v591_v59 = vrot.slane %v590_v58, 4 }
 0x226   : > { %v592_v60 = vadd.f32 %v591_v59, %v590_v58 }
 0x228   : > { %v593_v61 = vrot.slane %v592_v60, 2 }
 0x22a   : > { %v594_v63 = vadd.f32 %v593_v61, %v592_v60 }
 0x22c   : > { %v595_v4 = vrot.slane %v594_v63, 1 }
 0x22e   : > { %v596_v7 = vadd.f32 %v595_v4, %v594_v63 }
 0x230   : > { %v597_v10 = vmul.f32 0.00390625, %v596_v7 }
 0x232   : > { %v608_v13 = vmul.f32 %v597_v10, %v597_v10 }
 0x23e   : > { %v984_v62 = vpop.f32.mrf.mxu1 }
 0x23f   : > { %v599_v1 = vsel %vm587_vm6, %v984_v62, 0.0 }
 0x240   : > { %v578_v0 = vpop.f32.mrf.mxu1 }
 0x241   : > { %v598_v2 = vsel %vm587_vm6, %v578_v0, 0.0 }
 0x242   : > { %v600_v3 = vadd.f32 %v599_v1, %v598_v2 }
 0x244   : > { %v601_v5 = vrot.slane %v600_v3, 4 }
 0x246   : > { %v602_v6 = vadd.f32 %v601_v5, %v600_v3 }
 0x248   : > { %v603_v8 = vrot.slane %v602_v6, 2 }
 0x24a   : > { %v604_v9 = vadd.f32 %v603_v8, %v602_v6 }
 0x24c   : > { %v605_v11 = vrot.slane %v604_v9, 1 }
 0x24e   : > { %v606_v12 = vadd.f32 %v605_v11, %v604_v9 }
 0x250   : > { %v607_v14 = vmul.f32 0.00390625, %v606_v12 }
 0x252   : > { %v609_v15 = vsub.f32 %v607_v14, %v608_v13 }
 0x254   : > { %v611_v16 = vadd.f32 1e-05, %v609_v15 }
 0x256   : > { %1058 = vrsqrt.f32 %v611_v16 }
 0x263   : > { %v1059_v21 = vpop.eup %1058 }
 0x264   : > { %v1441_v22 = vmul.f32 %v1059_v21, %v610_v19 }
 0x266   : > { %v615_v23 = vmul.f32 %v1441_v22, %v597_v10  ;;  %v621_v24 = vrot.slane %v1441_v22, %v1439_v20 }
 0x268   : > { %628 = vrot.lane.b32.xlu0 %v621_v24, %s1125_s23  ;;  %622 = vrot.lane.b32.xlu1 %v621_v24, %s1126_s25  ;;  %v1450_v26 = vsub.f32 %v614_v25, %v615_v23 }
 0x26a   : > { %v697_v27 = vrot.slane %v1450_v26, %v1439_v20 }
 0x26c   : > { %631 = vrot.lane.b32.xlu0 %v621_v24, %s1127_s30  ;;  %625 = vrot.lane.b32.xlu1 %v621_v24, %s1124_s13 }
 0x270   : > { %634 = vrot.lane.b32.xlu0 %v621_v24, %s1128_s6  ;;  %698 = vrot.lane.b32.xlu1 %v697_v27, %s1126_s25 }
 0x274   : > { %637 = vrot.lane.b32.xlu0 %v621_v24, %s1129_s7  ;;  %701 = vrot.lane.b32.xlu1 %v697_v27, %s1124_s13  ;;  %s1136_s13 = smov 112  }
 0x278   : > { %640 = vrot.lane.b32.xlu0 %v621_v24, %s1130_s8  ;;  %704 = vrot.lane.b32.xlu1 %v697_v27, %s1125_s23 }
 0x27c   : > { %643 = vrot.lane.b32.xlu0 %v621_v24, %s1131_s9  ;;  %707 = vrot.lane.b32.xlu1 %v697_v27, %s1127_s30 }
 0x280   : > { %646 = vrot.lane.b32.xlu0 %v621_v24, %s1123_s26  ;;  %710 = vrot.lane.b32.xlu1 %v697_v27, %s1128_s6 }
 0x284   : > { %649 = vrot.lane.b32.xlu0 %v621_v24, %s1132_s10  ;;  %713 = vrot.lane.b32.xlu1 %v697_v27, %s1129_s7 }
 0x288   : > { %652 = vrot.lane.b32.xlu0 %v621_v24, %s1133_s11  ;;  %716 = vrot.lane.b32.xlu1 %v697_v27, %s1130_s8  ;;  %s1500_s8 = scalar_lea.hbm %s1550_s5, %s878_s17 }
 0x28c   : > { %655 = vrot.lane.b32.xlu0 %v621_v24, %s1134_s12  ;;  %719 = vrot.lane.b32.xlu1 %v697_v27, %s1131_s9 }
 0x290   : > { %658 = vrot.lane.b32.xlu0 %v621_v24, %s1135_s14  ;;  %722 = vrot.lane.b32.xlu1 %v697_v27, %s1123_s26  ;;  %s215_s26 = sand.u32 1, %s1112_s19  }
 0x291   : > { %s854_s16 = sshll.u32 %s215_s26, 4  ;;  %s1504_s9 = scalar_lea.sflag [#allocation3], %s215_s26 }
 0x292   : > { %s217_s23 = scalar_lea.vmem [#allocation2], %s854_s16 }
 0x293   : > { %s788_s30 = sshll.u32 %s217_s23, 4  ;;  %s1502_s30 = int_to_ptr.vmem [resolvable:$true] %s788_s30 }
 0x294   : > { %661 = vrot.lane.b32.xlu0 %v621_v24, %s1136_s13  ;;  %725 = vrot.lane.b32.xlu1 %v697_v27, %s1132_s10  ;;  %s1060_s22 = scalar_lea.vmem %s1502_s30, 256  ;;  %s1138_s10 = smov [#allocation2]  }
 0x295   : > { %p1061_p11 = scmp.ne.s32.totalorder %s1502_s30, %s1060_s22 }
 0x297   : > { %p1062_p12 = pnand %p1061_p11, %p1208_p5 }
 0x298   : > { %664 = vrot.lane.b32.xlu0 %v621_v24, %s1137_s15  ;;  %728 = vrot.lane.b32.xlu1 %v697_v27, %s1133_s11  ;;  %s1064_s11 = sshll.u32 %s1138_s10, 4  ;;  %s1065_s11 = int_to_ptr.vmem [resolvable:$false] %s1064_s11 }
 0x299   : > { %p1063_p13 = pneg %p1062_p12  ;;  %p1067_p0 = scmp.lt.s32.totalorder %s1502_s30, %s1065_s11 }
 0x29c   : > { %737 = vrot.lane.b32.xlu0 %v697_v27, %s1136_s13  ;;  %731 = vrot.lane.b32.xlu1 %v697_v27, %s1134_s12  ;;  %s1066_s12 = scalar_lea.vmem %s1065_s11, 512 }
 0x29d   : > { %p1068_p1 = scmp.lt.s32.totalorder %s1066_s12, %s1060_s22 }
 0x29f   : > { %p1069_p2 = por %p1068_p1, %p1067_p0 }
 0x2a0   : > { %734 = vrot.lane.b32.xlu1 %v697_v27, %s1135_s14 }
 0x2a1   : > { %p1070_p3 = pnand %p1069_p2, %p1063_p13 }
 0x2a4   : > { %740 = vrot.lane.b32.xlu1 %v697_v27, %s1137_s15 }
 0x2da   : > { %v629_v28 = vpop.permute.xlu0 %628  ;;  %v623_v29 = vpop.permute.xlu1 %622 }
 0x2db   : > { %v667_v46 = vsel %vm587_vm6, %v1441_v22, %v623_v29 }
 0x2de   : > { %v632_v30 = vpop.permute.xlu0 %631  ;;  %v626_v31 = vpop.permute.xlu1 %625 }
 0x2df   : > { %v668_v47 = vsel %vm260_vm3, %v667_v46, %v626_v31 }
 0x2e0   : > { %v670_v52 = vsel %vm669_vm7, %v668_v47, %v629_v28 }
 0x2e1   : > { %v672_v55 = vsel %vm671_vm8, %v670_v52, %v632_v30 }
 0x2e2   : > { %v635_v32 = vpop.permute.xlu0 %634  ;;  %v699_v33 = vpop.permute.xlu1 %698 }
 0x2e3   : > { %v674_v57 = vsel %vm673_vm9, %v672_v55, %v635_v32  ;;  %v743_v58 = vsel %vm587_vm6, %v1450_v26, %v699_v33 }
 0x2e6   : > { %v638_v34 = vpop.permute.xlu0 %637  ;;  %v702_v35 = vpop.permute.xlu1 %701 }
 0x2e7   : > { %v676_v59 = vsel %vm675_vm10, %v674_v57, %v638_v34  ;;  %v744_v60 = vsel %vm260_vm3, %v743_v58, %v702_v35 }
 0x2ea   : > { %v641_v36 = vpop.permute.xlu0 %640  ;;  %v705_v37 = vpop.permute.xlu1 %704 }
 0x2eb   : > { %v678_v62 = vsel %vm677_vm11, %v676_v59, %v641_v36  ;;  %v745_v63 = vsel %vm669_vm7, %v744_v60, %v705_v37 }
 0x2ee   : > { %v644_v38 = vpop.permute.xlu0 %643  ;;  %v708_v39 = vpop.permute.xlu1 %707 }
 0x2ef   : > { %v680_v0 = vsel %vm679_vm12, %v678_v62, %v644_v38  ;;  %v746_v1 = vsel %vm671_vm8, %v745_v63, %v708_v39 }
 0x2f2   : > { %v647_v40 = vpop.permute.xlu0 %646  ;;  %v711_v41 = vpop.permute.xlu1 %710 }
 0x2f3   : > { %v681_v3 = vsel %vm256_vm5, %v680_v0, %v647_v40  ;;  %v747_v4 = vsel %vm673_vm9, %v746_v1, %v711_v41 }
 0x2f6   : > { %v650_v42 = vpop.permute.xlu0 %649  ;;  %v714_v43 = vpop.permute.xlu1 %713 }
 0x2f7   : > { %v683_v5 = vsel %vm682_vm13, %v681_v3, %v650_v42  ;;  %v748_v6 = vsel %vm675_vm10, %v747_v4, %v714_v43 }
 0x2fa   : > { %v653_v44 = vpop.permute.xlu0 %652  ;;  %v717_v45 = vpop.permute.xlu1 %716 }
 0x2fb   : > { %v684_v7 = vsel %vm371_vm4, %v683_v5, %v653_v44  ;;  %v749_v8 = vsel %vm677_vm11, %v748_v6, %v717_v45 }
 0x2fe   : > { %v656_v49 = vpop.permute.xlu0 %655  ;;  %v720_v50 = vpop.permute.xlu1 %719 }
 0x2ff   : > { %v686_v9 = vsel %vm685_vm14, %v684_v7, %v656_v49  ;;  %v750_v10 = vsel %vm679_vm12, %v749_v8, %v720_v50 }
 0x302   : > { %v659_v53 = vpop.permute.xlu0 %658  ;;  %v723_v54 = vpop.permute.xlu1 %722 }
 0x303   : > { %v688_v13 = vsel %vm687_vm15, %v686_v9, %v659_v53  ;;  %v751_v14 = vsel %vm256_vm5, %v750_v10, %v723_v54 }
 0x306   : > { %v726_v56 = vpop.permute.xlu1 %725  ;;  %v662_v61 = vpop.permute.xlu0 %661 }
 0x307   : > { %v690_v15 = vsel %vm689_vm0, %v688_v13, %v662_v61  ;;  %v752_v16 = vsel %vm682_vm13, %v751_v14, %v726_v56 }
 0x30a   : > { %v729_v2 = vpop.permute.xlu1 %728  ;;  %v665_v11 = vpop.permute.xlu0 %664 }
 0x30b   : > { %v692_v17 = vsel %vm691_vm1, %v690_v15, %v665_v11  ;;  %v753_v18 = vsel %vm371_vm4, %v752_v16, %v729_v2 }
 0x30c   : > { %v761_v23 = vrot.slane %v692_v17, %v1439_v20 }
 0x30e   : > { %v732_v12 = vpop.permute.xlu1 %731  ;;  %v738_v24 = vpop.permute.xlu0 %737  ;;  %v762_v28 = vmul.f32 %v761_v23, %v1395_v48  ;;  %v763_v29 = vmul.f32 %v761_v23, %v1400_v51 }
 0x30f   : > { %v754_v19 = vsel %vm685_vm14, %v753_v18, %v732_v12 }
 0x312   : > { %v735_v21 = vpop.permute.xlu1 %734 }
 0x313   : > { %v755_v22 = vsel %vm687_vm15, %v754_v19, %v735_v21 }
 0x314   : > { %v756_v25 = vsel %vm689_vm0, %v755_v22, %v738_v24 }
 0x316   : > { %v741_v26 = vpop.permute.xlu1 %740 }
 0x317   : > { %v757_v27 = vsel %vm691_vm1, %v756_v25, %v741_v26 }
 0x318   : > { %v767_v30 = vrot.slane %v757_v27, %v1439_v20 }
 0x31a   : > { %v768_v31 = vadd.f32 %v767_v30, %v762_v28  ;;  %v769_v32 = vadd.f32 %v767_v30, %v763_v29 }
 0x31c   : > { %v770_v33 = vmax.f32 %v768_v31, 0.0  ;;  %v771_v34 = vmax.f32 %v769_v32, 0.0 }
 0x31e   : > { %772 = vst [vmem:[%s217_s23] sm:$0xff] %v770_v33  ;;  %773 = vst [vmem:[%s217_s23 + $0x8] sm:$0xff] %v771_v34 }
 0x31f   : > { %1073 = shalt.err (!%p1070_p3)
}
 0x320   : > { %s1074_s14 = scalar_lea.hbm %s1500_s8, 256  ;;  %s1078_s26 = scalar_lea.hbm %s1550_s5, 512 }
 0x321   : > { %p1075_p4 = scmp.ne.s32.totalorder %s1500_s8, %s1074_s14  ;;  %p1079_p9 = scmp.lt.s32.totalorder %s1500_s8, %s1550_s5 }
 0x322   : > { %p1080_p10 = scmp.lt.s32.totalorder %s1078_s26, %s1074_s14 }
 0x323   : > { %p1076_p7 = pnand %p1075_p4, %p1208_p5 }
 0x324   : > { %p1081_p11 = por %p1080_p10, %p1079_p9 }
 0x325   : > { %p1077_p8 = pneg %p1076_p7 }
 0x327   : > { %p1082_p12 = pnand %p1081_p11, %p1077_p8 }
 0x329   : > { %1085 = shalt.err (!%p1082_p12)
}
 0x32a   : > { %s1139_s23 = smov 128  }
 0x32b   : > { %986 = dma.vmem_to_hbm [thread:$0]  (%p1208_p5), %s1502_s30, 256, %s1500_s8, %s1504_s9, %s1139_s23, %s1139_s23, %s1126_s25  }
 0x32c PF: > { %p992_p13 = scmp.ge.s32.totalorder %s1120_s21, 2  ;;  %s803_s6 = sand.u32 1, %s1108_s18  }
 0x32d   : > { %s804_s7 = scalar_lea.sflag [#allocation3], %s803_s6 }
 0x32e   : > { %p989_p0 = pnand %p992_p13, %p1212_p6 }
 0x330   : > { %p990_p1 = pneg %p989_p0 }
 0x332   : > { %1103 = dma.done.wait (%p990_p1), %s804_s7, 256  }
 0x333   : > { %1105 = vsyncadd (%p990_p1), %s804_s7, 4294967040  ;;  %p15_p2 = scmp.ge.s32.totalorder %s1195_s24, 4   ;;  %s1553_s18 = smov %s1112_s19 }
 0x334   : > { %s1554_s19 = smov %s1116_s20  ;;  %s1555_s20 = smov %s1206_s27 }
 0x335   : > { %s1556_s21 = smov %s1195_s24  ;;  %17 = sbr.rel (!%p15_p2) target bundleno = 3 (0x3), region = 75 }
 0x33a   :  { %809 = vsyncpa [#allocation3], 1 }
 0x33b   :  { %811 = vsyncpa [#allocation3 + $0x1], 1 }

</bundles_post_ra>
